<compile_context>
chip_gen: v7x
topology: tpu7x:2x2x1
jax: 0.10.0
libtpu: 0.0.40
codegen_flags: <defaults>
</compile_context>

<pallas_src>
import functools

import jax
import jax.numpy as jnp
from jax.experimental import pallas as pl
from jax.experimental.pallas import tpu as pltpu

_LANES = 512                     # lanes per row = 128 boxes x 4 interleaved sides
_BOXES_PER_ROW = _LANES // 4
_DEFAULT_BLOCK_ROWS = 512        # up to 512 rows (64K boxes / 2 MiB f32) per step


def _cdiv(a, b):
    return (a + b - 1) // b


def _round_up(a, b):
    return _cdiv(a, b) * b


def _make_iou_kernel(loc_loss_type, has_weight, n, tm):
    if loc_loss_type not in ("iou", "giou"):
        raise ValueError(f"unsupported loc_loss_type: {loc_loss_type}")

    boxes_per_block = tm * _BOXES_PER_ROW

    def kernel(pred_ref, targ_ref, *rest):
        if has_weight:
            w_ref, out_ref, acc_l, acc_wl = rest
        else:
            out_ref, acc_l = rest
            w_ref = acc_wl = None

        i = pl.program_id(0)
        nblk = pl.num_programs(0)

        @pl.when(i == 0)
        def _init():
            acc_l[...] = jnp.zeros_like(acc_l)
            if has_weight:
                acc_wl[...] = jnp.zeros_like(acc_wl)

        # (tm, 512) blocks; lanes 4b .. 4b+3 hold (l, t, r, b) of box b.
        x = pred_ref[...].astype(jnp.float32)
        y = targ_ref[...].astype(jnp.float32)

        def shifted(a, k):
            # Lane j of the result holds lane (j + k) of `a`; lanes that wrap
            # around land only at positions whose values are never consumed.
            return pltpu.roll(a, _LANES - k, axis=1)

        def pair_sum(a):
            # lane 4b -> a[l] + a[r]; lane 4b+1 -> a[t] + a[b]
            return a + shifted(a, 2)

        def box_prod(a):
            # lane 4b -> a[4b] * a[4b+1]
            return a * shifted(a, 1)

        mn = jnp.minimum(x, y)
        sum_p, sum_t, sum_mn = pair_sum(x), pair_sum(y), pair_sum(mn)
        pred_area = box_prod(sum_p)
        target_area = box_prod(sum_t)
        area_int = box_prod(sum_mn)
        area_union = target_area + pred_area - area_int
        ious = (area_int + 1.0) / (area_union + 1.0)

        if loc_loss_type == "iou":
            loss = -jnp.log(ious)
        else:  # giou
            mx = jnp.maximum(x, y)
            g_int = box_prod(pair_sum(mx)) + 1e-07
            gious = ious - (g_int - area_union) / g_int
            loss = 1.0 - gious
        # `loss` is only meaningful at lanes with lane % 4 == 0 (one per box);
        # the other lanes hold cross-box garbage and are masked at finalize.

        wloss = None
        if has_weight:
            wloss = loss * w_ref[...].astype(jnp.float32)

        block_start = i * boxes_per_block

        @pl.when(block_start + boxes_per_block <= n)
        def _interior():                 # fully valid block: no mask work
            acc_l[...] += loss
            if has_weight:
                acc_wl[...] += wloss

        @pl.when(block_start + boxes_per_block > n)
        def _boundary():                 # straddles the ragged / padded tail
            row = jax.lax.broadcasted_iota(jnp.int32, (tm, _LANES), 0)
            lane = jax.lax.broadcasted_iota(jnp.int32, (tm, _LANES), 1)
            box = block_start + row * _BOXES_PER_ROW + (lane >> 2)
            valid = box < n
            acc_l[...] += jnp.where(valid, loss, 0.0)
            if has_weight:
                acc_wl[...] += jnp.where(valid, wloss, 0.0)

        @pl.when(i == nblk - 1)
        def _finalize():                 # single lane-dense output write
            lane = jax.lax.broadcasted_iota(jnp.int32, (tm, _LANES), 1)
            c0 = (lane & 3) == 0
            out_lane = jax.lax.broadcasted_iota(jnp.int32, (1, 128), 1)
            out_row = jnp.where(out_lane == 0,
                                jnp.sum(jnp.where(c0, acc_l[...], 0.0)), 0.0)
            if has_weight:
                out_row = jnp.where(out_lane == 1,
                                    jnp.sum(jnp.where(c0, acc_wl[...], 0.0)),
                                    out_row)
            out_ref[...] = out_row

    return kernel


@functools.partial(
    jax.jit, static_argnames=("loc_loss_type", "has_weight", "block_rows"))
def _iou_loss_impl(out, target, weight, loc_loss_type, has_weight, block_rows):
    n = out.shape[0]
    n_rows = _cdiv(n, _BOXES_PER_ROW)

    # Stream boxes in their source dtype when it is a <=32-bit float; the
    # kernel upcasts to f32 after the load.
    box_dtype = out.dtype
    if (out.dtype != target.dtype
            or not jnp.issubdtype(out.dtype, jnp.floating)
            or jnp.dtype(out.dtype).itemsize > 4):
        box_dtype = jnp.float32
    pred = out.astype(box_dtype)
    targ = target.astype(box_dtype)

    # Sublane packing granularity for the block row dim (16 for bf16/fp16).
    sub = 8 * (4 // jnp.dtype(box_dtype).itemsize)
    tm = min(_round_up(block_rows, sub), _round_up(max(n_rows, 1), sub))
    nblk = _cdiv(n_rows, tm)

    def _rows(a):
        flat = a.reshape(-1)
        pad = n_rows * _LANES - flat.shape[0]
        if pad:
            # Streaming pad only when 4N is not a multiple of 512; when the
            # producer emits N % 128 == 0 this is a pure bitcast (zero copy).
            flat = jnp.pad(flat, (0, pad))
        return flat.reshape(n_rows, _LANES)

    pred_r = _rows(pred)
    targ_r = _rows(targ)

    block = pl.BlockSpec((tm, _LANES), lambda i: (i, 0))
    in_specs = [block, block]
    inputs = [pred_r, targ_r]
    scratch = [pltpu.VMEM((tm, _LANES), jnp.float32)]

    if has_weight:
        # Weighted calls only: broadcast the weight 4-wide so it sits on the
        # same lane as the per-box loss (one small host-side copy).
        w4 = jnp.broadcast_to(weight.astype(jnp.float32)[:, None], (n, 4))
        inputs.append(_rows(w4))
        in_specs.append(block)
        scratch.append(pltpu.VMEM((tm, _LANES), jnp.float32))

    parts = pl.pallas_call(
        _make_iou_kernel(loc_loss_type, has_weight, n, tm),
        out_shape=jax.ShapeDtypeStruct((1, 128), jnp.float32),
        grid_spec=pltpu.PrefetchScalarGridSpec(
            num_scalar_prefetch=0,
            grid=(nblk,),
            in_specs=in_specs,
            out_specs=pl.BlockSpec((1, 128), lambda i: (0, 0)),
            scratch_shapes=scratch,
        ),
        compiler_params=pltpu.CompilerParams(
            dimension_semantics=("arbitrary",)),
    )(*inputs)

    mean_loss = parts[0, 0] / jnp.float32(n)
    if not has_weight:
        return mean_loss
    wsum = jnp.sum(weight.astype(jnp.float32))
    safe_wsum = jnp.where(wsum > 0.0, wsum, 1.0)
    return jnp.where(wsum > 0.0, parts[0, 1] / safe_wsum, mean_loss)


def iou_loss(out, target, weight=None, *, loc_loss_type="iou",
             block_rows=_DEFAULT_BLOCK_ROWS):
    """out, target: (N, 4) boxes (l, t, r, b); weight: (N,) or None."""
    return _iou_loss_impl(out, target, weight, loc_loss_type,
                          weight is not None, block_rows)


def _iou_loss_ref(out, target, weight=None, *, loc_loss_type="iou"):
    """Pure-JAX reference mirroring the PyTorch module."""
    out = out.astype(jnp.float32)
    target = target.astype(jnp.float32)
    p_l, p_t, p_r, p_b = [out[:, i] for i in range(4)]
    t_l, t_t, t_r, t_b = [target[:, i] for i in range(4)]
    target_area = (t_l + t_r) * (t_t + t_b)
    pred_area = (p_l + p_r) * (p_t + p_b)
    w_i = jnp.minimum(p_l, t_l) + jnp.minimum(p_r, t_r)
    h_i = jnp.minimum(p_b, t_b) + jnp.minimum(p_t, t_t)
    area_i = w_i * h_i
    area_u = target_area + pred_area - area_i
    ious = (area_i + 1.0) / (area_u + 1.0)
    if loc_loss_type == "iou":
        loss = -jnp.log(ious)
    else:
        g_w = jnp.maximum(p_l, t_l) + jnp.maximum(p_r, t_r)
        g_h = jnp.maximum(p_b, t_b) + jnp.maximum(p_t, t_t)
        g = g_w * g_h + 1e-07
        gious = ious - (g - area_u) / g
        loss = 1 - gious
    if weight is not None and jnp.sum(weight) > 0:
        return jnp.sum(loss * weight.astype(jnp.float32)) / jnp.sum(weight)
    return jnp.mean(loss)


if __name__ == "__main__":
    key = jax.random.PRNGKey(0)
    ok = True
    # (N, block_rows): small primary shape; a ragged shape (padding + boundary
    # mask); an aligned shape (zero-copy path, no boundary); and a forced
    # multi-block shape (init / interior / boundary / finalize across blocks).
    cases = ((8, _DEFAULT_BLOCK_ROWS), (777, _DEFAULT_BLOCK_ROWS),
             (1024, _DEFAULT_BLOCK_ROWS), (2000, 8))
    for n, brows in cases:
        k1, k2, k3 = jax.random.split(jax.random.fold_in(key, n), 3)
        boxes_p = jnp.abs(jax.random.normal(k1, (n, 4), jnp.float32)) * 4.0
        boxes_t = jnp.abs(jax.random.normal(k2, (n, 4), jnp.float32)) * 4.0
        w = jnp.abs(jax.random.normal(k3, (n,), jnp.float32))
        zero_w = jnp.zeros((n,), jnp.float32)  # exercises weight.sum()==0 fallback
        for llt in ("iou", "giou"):
            for wt in (None, w, zero_w):
                got = jax.block_until_ready(
                    iou_loss(boxes_p, boxes_t, wt, loc_loss_type=llt,
                             block_rows=brows))
                ref = _iou_loss_ref(boxes_p, boxes_t, wt, loc_loss_type=llt)
                if not (jnp.isfinite(got)
                        and jnp.allclose(got, ref, rtol=1e-4, atol=1e-5)):
                    ok = False
                    print(f"MISMATCH n={n} type={llt} weighted={wt is not None}"
                          f": got={got} ref={ref}")
    if ok:
        print("KERNEL_OK")
</pallas_src>

<mosaic_0001>
module attributes {stable_mosaic.version = 11 : i64} {
  func.func @kernel(%arg0: i32, %arg1: memref<8x512xf32, #tpu.memory_space<vmem>>, %arg2: memref<8x512xf32, #tpu.memory_space<vmem>>, %arg3: memref<1x128xf32, #tpu.memory_space<vmem>>, %arg4: memref<8x512xf32, #tpu.memory_space<vmem>>) attributes {dimension_semantics = [#tpu.dimension_semantics<arbitrary>], iteration_bounds = array<i64: 1>, scalar_prefetch = 0 : i64, scratch_operands = 1 : i64, tpu.core_type = #tpu.core_type<tc>, window_params = [{transform_indices = @transform_0, window_bounds = array<i64: 8, 512>}, {transform_indices = @transform_1, window_bounds = array<i64: 8, 512>}, {pipeline_mode = #tpu.pipeline_mode<synchronous>, transform_indices = @transform_2, window_bounds = array<i64: 1, 128>}]} {
    %c0_i32 = arith.constant 0 : i32
    %0 = arith.cmpi eq, %arg0, %c0_i32 : i32
    %1 = arith.extui %0 : i1 to i32
    %c0_i32_0 = arith.constant 0 : i32
    %2 = arith.cmpi ne, %1, %c0_i32_0 : i32
    scf.if %2 {
      %cst_17 = arith.constant 0.000000e+00 : f32
      %40 = vector.broadcast %cst_17 : f32 to vector<8x512xf32>
      %c0_18 = arith.constant 0 : index
      %c0_19 = arith.constant 0 : index
      %41 = vector.load %arg4[%c0_18, %c0_19] : memref<8x512xf32, #tpu.memory_space<vmem>>, vector<8x512xf32>
      tpu.vector_store %arg4[%c0_18, %c0_19], %40 {strides = array<i32>} : memref<8x512xf32, #tpu.memory_space<vmem>>, vector<8x512xf32>,
    } else {
    }
    %c0 = arith.constant 0 : index
    %c0_1 = arith.constant 0 : index
    %3 = vector.load %arg1[%c0, %c0_1] : memref<8x512xf32, #tpu.memory_space<vmem>>, vector<8x512xf32>
    %c0_2 = arith.constant 0 : index
    %c0_3 = arith.constant 0 : index
    %4 = vector.load %arg2[%c0_2, %c0_3] : memref<8x512xf32, #tpu.memory_space<vmem>>, vector<8x512xf32>
    %5 = arith.minimumf %3, %4 : vector<8x512xf32>
    %c510_i32 = arith.constant 510 : i32
    %6 = tpu.dynamic_rotate %3 by %c510_i32 dim 1 : vector<8x512xf32>, i32 -> vector<8x512xf32>
    %7 = arith.addf %3, %6 : vector<8x512xf32>
    %c510_i32_4 = arith.constant 510 : i32
    %8 = tpu.dynamic_rotate %4 by %c510_i32_4 dim 1 : vector<8x512xf32>, i32 -> vector<8x512xf32>
    %9 = arith.addf %4, %8 : vector<8x512xf32>
    %c510_i32_5 = arith.constant 510 : i32
    %10 = tpu.dynamic_rotate %5 by %c510_i32_5 dim 1 : vector<8x512xf32>, i32 -> vector<8x512xf32>
    %11 = arith.addf %5, %10 : vector<8x512xf32>
    %c511_i32 = arith.constant 511 : i32
    %12 = tpu.dynamic_rotate %7 by %c511_i32 dim 1 : vector<8x512xf32>, i32 -> vector<8x512xf32>
    %13 = arith.mulf %7, %12 : vector<8x512xf32>
    %c511_i32_6 = arith.constant 511 : i32
    %14 = tpu.dynamic_rotate %9 by %c511_i32_6 dim 1 : vector<8x512xf32>, i32 -> vector<8x512xf32>
    %15 = arith.mulf %9, %14 : vector<8x512xf32>
    %c511_i32_7 = arith.constant 511 : i32
    %16 = tpu.dynamic_rotate %11 by %c511_i32_7 dim 1 : vector<8x512xf32>, i32 -> vector<8x512xf32>
    %17 = arith.mulf %11, %16 : vector<8x512xf32>
    %18 = arith.addf %15, %13 : vector<8x512xf32>
    %19 = arith.subf %18, %17 : vector<8x512xf32>
    %cst = arith.constant 1.000000e+00 : f32
    %20 = vector.broadcast %cst : f32 to vector<8x512xf32>
    %21 = arith.addf %17, %20 : vector<8x512xf32>
    %cst_8 = arith.constant 1.000000e+00 : f32
    %22 = vector.broadcast %cst_8 : f32 to vector<8x512xf32>
    %23 = arith.addf %19, %22 : vector<8x512xf32>
    %24 = arith.divf %21, %23 : vector<8x512xf32>
    %25 = math.log %24 : vector<8x512xf32>
    %cst_9 = arith.constant 0.000000e+00 : f32
    %26 = vector.broadcast %cst_9 : f32 to vector<8x512xf32>
    %27 = arith.subf %26, %25 : vector<8x512xf32>
    %c1024_i32 = arith.constant 1024 : i32
    %28 = arith.muli %arg0, %c1024_i32 : i32
    %c1024_i32_10 = arith.constant 1024 : i32
    %29 = arith.addi %28, %c1024_i32_10 : i32
    %c8_i32 = arith.constant 8 : i32
    %30 = arith.cmpi sle, %29, %c8_i32 : i32
    %31 = arith.extui %30 : i1 to i32
    %c0_i32_11 = arith.constant 0 : i32
    %32 = arith.cmpi ne, %31, %c0_i32_11 : i32
    scf.if %32 {
      %c0_17 = arith.constant 0 : index
      %c0_18 = arith.constant 0 : index
      %40 = vector.load %arg4[%c0_17, %c0_18] : memref<8x512xf32, #tpu.memory_space<vmem>>, vector<8x512xf32>
      %41 = arith.addf %40, %27 : vector<8x512xf32>
      %c0_19 = arith.constant 0 : index
      %c0_20 = arith.constant 0 : index
      %42 = vector.load %arg4[%c0_19, %c0_20] : memref<8x512xf32, #tpu.memory_space<vmem>>, vector<8x512xf32>
      tpu.vector_store %arg4[%c0_19, %c0_20], %41 {strides = array<i32>} : memref<8x512xf32, #tpu.memory_space<vmem>>, vector<8x512xf32>,
    } else {
    }
    %c1024_i32_12 = arith.constant 1024 : i32
    %33 = arith.addi %28, %c1024_i32_12 : i32
    %c8_i32_13 = arith.constant 8 : i32
    %34 = arith.cmpi sgt, %33, %c8_i32_13 : i32
    %35 = arith.extui %34 : i1 to i32
    %c0_i32_14 = arith.constant 0 : i32
    %36 = arith.cmpi ne, %35, %c0_i32_14 : i32
    scf.if %36 {
      %40 = tpu.iota {dimensions = array<i32: 0>} : vector<8x512xi32>
      %41 = tpu.iota {dimensions = array<i32: 1>} : vector<8x512xi32>
      %c128_i32 = arith.constant 128 : i32
      %42 = vector.broadcast %c128_i32 : i32 to vector<8x512xi32>
      %43 = arith.muli %40, %42 : vector<8x512xi32>
      %44 = vector.broadcast %28 : i32 to vector<8x512xi32>
      %45 = arith.addi %44, %43 : vector<8x512xi32>
      %c2_i32 = arith.constant 2 : i32
      %46 = vector.broadcast %c2_i32 : i32 to vector<8x512xi32>
      %47 = arith.shrsi %41, %46 : vector<8x512xi32>
      %48 = arith.addi %45, %47 : vector<8x512xi32>
      %c8_i32_17 = arith.constant 8 : i32
      %49 = vector.broadcast %c8_i32_17 : i32 to vector<8x512xi32>
      %50 = arith.cmpi slt, %48, %49 : vector<8x512xi32>
      %c0_18 = arith.constant 0 : index
      %c0_19 = arith.constant 0 : index
      %51 = vector.load %arg4[%c0_18, %c0_19] : memref<8x512xf32, #tpu.memory_space<vmem>>, vector<8x512xf32>
      %cst_20 = arith.constant 0.000000e+00 : f32
      %52 = vector.broadcast %cst_20 : f32 to vector<8x512xf32>
      %53 = arith.select %50, %27, %52 : vector<8x512xi1>, vector<8x512xf32>
      %54 = arith.addf %51, %53 : vector<8x512xf32>
      %c0_21 = arith.constant 0 : index
      %c0_22 = arith.constant 0 : index
      %55 = vector.load %arg4[%c0_21, %c0_22] : memref<8x512xf32, #tpu.memory_space<vmem>>, vector<8x512xf32>
      tpu.vector_store %arg4[%c0_21, %c0_22], %54 {strides = array<i32>} : memref<8x512xf32, #tpu.memory_space<vmem>>, vector<8x512xf32>,
    } else {
    }
    %c0_i32_15 = arith.constant 0 : i32
    %37 = arith.cmpi eq, %arg0, %c0_i32_15 : i32
    %38 = arith.extui %37 : i1 to i32
    %c0_i32_16 = arith.constant 0 : i32
    %39 = arith.cmpi ne, %38, %c0_i32_16 : i32
    scf.if %39 {
      %40 = tpu.iota {dimensions = array<i32: 1>} : vector<8x512xi32>
      %c3_i32 = arith.constant 3 : i32
      %41 = vector.broadcast %c3_i32 : i32 to vector<8x512xi32>
      %42 = arith.andi %40, %41 : vector<8x512xi32>
      %c0_i32_17 = arith.constant 0 : i32
      %43 = vector.broadcast %c0_i32_17 : i32 to vector<8x512xi32>
      %44 = arith.cmpi eq, %42, %43 : vector<8x512xi32>
      %45 = tpu.iota {dimensions = array<i32: 1>} : vector<1x128xi32>
      %c0_i32_18 = arith.constant 0 : i32
      %46 = vector.broadcast %c0_i32_18 : i32 to vector<1x128xi32>
      %47 = arith.cmpi eq, %45, %46 : vector<1x128xi32>
      %c0_19 = arith.constant 0 : index
      %c0_20 = arith.constant 0 : index
      %48 = vector.load %arg4[%c0_19, %c0_20] : memref<8x512xf32, #tpu.memory_space<vmem>>, vector<8x512xf32>
      %cst_21 = arith.constant 0.000000e+00 : f32
      %49 = vector.broadcast %cst_21 : f32 to vector<8x512xf32>
      %50 = arith.select %44, %48, %49 : vector<8x512xi1>, vector<8x512xf32>
      %51 = vector.shape_cast %50 : vector<8x512xf32> to vector<1x8x512xf32>
      %cst_22 = arith.constant dense<0.000000e+00> : vector<1xf32>
      %52 = vector.multi_reduction <add>, %51, %cst_22 [1, 2] : vector<1x8x512xf32> to vector<1xf32>
      %53 = vector.shape_cast %52 : vector<1xf32> to vector<1x1x1xf32>
      %54 = vector.extract %53[0, 0, 0] : f32 from vector<1x1x1xf32>
      %cst_23 = arith.constant 0.000000e+00 : f32
      %55 = vector.broadcast %54 : f32 to vector<1x128xf32>
      %56 = vector.broadcast %cst_23 : f32 to vector<1x128xf32>
      %57 = arith.select %47, %55, %56 : vector<1x128xi1>, vector<1x128xf32>
      %c0_24 = arith.constant 0 : index
      %c0_25 = arith.constant 0 : index
      %58 = vector.load %arg3[%c0_24, %c0_25] : memref<1x128xf32, #tpu.memory_space<vmem>>, vector<1x128xf32>
      tpu.vector_store %arg3[%c0_24, %c0_25], %57 {strides = array<i32>} : memref<1x128xf32, #tpu.memory_space<vmem>>, vector<1x128xf32>,
    } else {
    }
    return
  }
  func.func @transform_0(%arg0: i32) -> (i32, i32) {
    %c0_i32 = arith.constant 0 : i32
    %c0_i32_0 = arith.constant 0 : i32
    return %arg0, %c0_i32 : i32, i32
  }
  func.func @transform_1(%arg0: i32) -> (i32, i32) {
    %c0_i32 = arith.constant 0 : i32
    %c0_i32_0 = arith.constant 0 : i32
    return %arg0, %c0_i32 : i32, i32
  }
  func.func @transform_2(%arg0: i32) -> (i32, i32) {
    %c0_i32 = arith.constant 0 : i32
    %c0_i32_0 = arith.constant 0 : i32
    %c0_i32_1 = arith.constant 0 : i32
    return %c0_i32, %c0_i32_0 : i32, i32
  }
}

</mosaic_0001>

<bundles_post_ra>
// kernel: _iou_loss_impl.1
= control target key start
LH: loop header
LB: loop body
LE: loop exit
PB: predicated region body
PF: predicated region fallthrough
CT: control target
= control target key end

     0   :  { %v58_v0 = vlaneseq  ;;  %v1504_v4 = vmov 1966171168   ;;  %s1506_s12 = smov 127   ;;  %s1975_s0 = inlined_call_operand.vmem [shape: f32[1,512], index: 0, kind: input, shape index: {}]   ;;  %s1976_s1 = inlined_call_operand.vmem [shape: f32[1,512], index: 1, kind: input, shape index: {}]   ;;  %s1977_s2 = inlined_call_operand.vmem [shape: f32[1,128], index: 2, kind: output, shape index: {}]  }
   0x1   :  { %v1525_v1 = vld [vmem:[%s1975_s0] sm:$0xf]  ;;  %v1530_v2 = vld [vmem:[%s1975_s0 + $0x4] sm:$0xf]  ;;  %v1535_v3 = vld [vmem:[%s1975_s0 + $0x8] sm:$0xf]  ;;  %v56_v5 = vunpack.c.l.s4 %v1504_v4 }
   0x2   :  { %v1540_v6 = vld [vmem:[%s1975_s0 + $0xc] sm:$0xf]  ;;  %v1545_v7 = vld [vmem:[%s1975_s0 + $0x10] sm:$0xf]  ;;  %v1550_v8 = vld [vmem:[%s1975_s0 + $0x14] sm:$0xf]  ;;  %v51_v9 = vcombine.low %v1525_v1, %v1530_v2 }
   0x3   :  { %v1557_v10 = vld [vmem:[%s1975_s0 + $0x18] sm:$0xf]  ;;  %v1562_v11 = vld [vmem:[%s1975_s0 + $0x1c] sm:$0xf]  ;;  %v52_v12 = vcombine.low %v1535_v3, %v1540_v6  ;;  %v53_v13 = vcombine.low %v1545_v7, %v1550_v8  ;;  %v57_v14 = vunpack.c.0.s8 %v56_v5  ;;  %v1569_v15 = vshrl.u32 %v58_v0, 7 }
   0x4   :  { %v54_v16 = vcombine.low %v1557_v10, %v1562_v11  ;;  %v1576_v17 = vld [vmem:[%s1976_s1] sm:$0xf]  ;;  %v1581_v18 = vld [vmem:[%s1976_s1 + $0x4] sm:$0xf]  ;;  %v1586_v19 = vld [vmem:[%s1976_s1 + $0x8] sm:$0xf] }
   0x5   :  { %v1589_v20 = vsub.s32 %v57_v14, %v1569_v15  ;;  %v1594_v21 = vld [vmem:[%s1976_s1 + $0xc] sm:$0xf]  ;;  %v1599_v22 = vld [vmem:[%s1976_s1 + $0x10] sm:$0xf]  ;;  %v1604_v23 = vld [vmem:[%s1976_s1 + $0x14] sm:$0xf]  ;;  %v234_v24 = vcombine.low %v1576_v17, %v1581_v18  ;;  %v1610_v25 = vmin.f32 %v1525_v1, %v1576_v17  ;;  %v1614_v26 = vmin.f32 %v1530_v2, %v1581_v18 }
   0x6   :  { %v1619_v27 = vld [vmem:[%s1976_s1 + $0x18] sm:$0xf]  ;;  %v1624_v28 = vld [vmem:[%s1976_s1 + $0x1c] sm:$0xf]  ;;  %v235_v29 = vcombine.low %v1586_v19, %v1594_v21  ;;  %v236_v30 = vcombine.low %v1599_v22, %v1604_v23  ;;  %v1632_v31 = vmin.f32 %v1535_v3, %v1586_v19  ;;  %v1636_v32 = vmin.f32 %v1540_v6, %v1594_v21  ;;  %s1505_s1 = smov 126  }
   0x7   :  { %v61_v33 = vrot.slane %v51_v9, %v1589_v20  ;;  %v68_v34 = vrot.slane %v52_v12, %v1589_v20  ;;  %v75_v35 = vrot.slane %v53_v13, %v1589_v20  ;;  %v82_v36 = vrot.slane %v54_v16, %v1589_v20 }
   0x8   :  { %v237_v37 = vcombine.low %v1619_v27, %v1624_v28  ;;  %v244_v38 = vrot.slane %v234_v24, %v1589_v20  ;;  %v251_v39 = vrot.slane %v235_v29, %v1589_v20  ;;  %v258_v40 = vrot.slane %v236_v30, %v1589_v20 }
   0x9   :  { %v83_v41 = vcombine.low %v61_v33, %v68_v34  ;;  %v85_v42 = vcombine.low %v75_v35, %v82_v36  ;;  %v84_v43 = vcombine.high %v61_v33, %v68_v34  ;;  %v86_v44 = vcombine.high %v75_v35, %v82_v36 }
   0xa   :  { %v265_v45 = vrot.slane %v237_v37, %v1589_v20  ;;  %v267_v46 = vcombine.high %v244_v38, %v251_v39  ;;  %v266_v47 = vcombine.low %v244_v38, %v251_v39  ;;  %v1650_v48 = vmin.f32 %v1545_v7, %v1599_v22 }
   0xb   :  { %v93_v49 = vrot.slane %v83_v41, %v1589_v20  ;;  %v107_v50 = vrot.slane %v85_v42, %v1589_v20  ;;  %v100_v51 = vrot.slane %v84_v43, %v1589_v20  ;;  %v114_v52 = vrot.slane %v86_v44, %v1589_v20 }
   0xc   :  { %v269_v53 = vcombine.high %v258_v40, %v265_v45  ;;  %v283_v54 = vrot.slane %v267_v46, %v1589_v20  ;;  %v268_v55 = vcombine.low %v258_v40, %v265_v45  ;;  %v276_v56 = vrot.slane %v266_v47, %v1589_v20 }
   0xd   :  { %v116_v57 = vcombine.high %v93_v49, %v107_v50  ;;  %v115_v58 = vcombine.low %v93_v49, %v107_v50  ;;  %v118_v59 = vcombine.high %v100_v51, %v114_v52  ;;  %v117_v60 = vcombine.low %v100_v51, %v114_v52 }
   0xe   :  { %v297_v61 = vrot.slane %v269_v53, %v1589_v20  ;;  %v290_v62 = vrot.slane %v268_v55, %v1589_v20  ;;  %v1662_v63 = vmin.f32 %v1550_v8, %v1604_v23  ;;  %v1666_v4 = vmin.f32 %v1557_v10, %v1619_v27 }
   0xf   :  { %127 = vrot.lane.b32.xlu1 %v116_v57, %s1505_s1  ;;  %123 = vrot.lane.b32.xlu0 %v115_v58, %s1505_s1  ;;  %v1672_v5 = vmin.f32 %v1562_v11, %v1624_v28  ;;  %v414_v9 = vcombine.low %v1610_v25, %v1614_v26  ;;  %v415_v12 = vcombine.low %v1632_v31, %v1636_v32  ;;  %v1701_v50 = vand.u32 127, %v58_v0 }
  0x10   :  { %v416_v13 = vcombine.low %v1650_v48, %v1662_v63  ;;  %v300_v29 = vcombine.low %v283_v54, %v297_v61  ;;  %v298_v30 = vcombine.low %v276_v56, %v290_v62  ;;  %v301_v39 = vcombine.high %v283_v54, %v297_v61 }
  0x11   :  { %v417_v14 = vcombine.low %v1666_v4, %v1672_v5  ;;  %v424_v16 = vrot.slane %v414_v9, %v1589_v20  ;;  %v431_v24 = vrot.slane %v415_v12, %v1589_v20  ;;  %v299_v40 = vcombine.high %v276_v56, %v290_v62 }
  0x12   :  { %v438_v33 = vrot.slane %v416_v13, %v1589_v20  ;;  %vm133_vm0 = vcmp.lt.s32.totalorder %v1701_v50, 126  ;;  %vm674_vm1 = vcmp.lt.s32.totalorder %v1701_v50, 127  ;;  %vm1431_vm10 = vcmp.eq.s32.totalorder %v1701_v50, 0 }
  0x13   :  { %129 = vrot.lane.b32.xlu1 %v118_v59, %s1505_s1  ;;  %125 = vrot.lane.b32.xlu0 %v117_v60, %s1505_s1  ;;  %v445_v34 = vrot.slane %v417_v14, %v1589_v20  ;;  %v447_v35 = vcombine.high %v424_v16, %v431_v24  ;;  %v446_v36 = vcombine.low %v424_v16, %v431_v24 }
  0x15   :  { %v449_v37 = vcombine.high %v438_v33, %v445_v34  ;;  %v448_v38 = vcombine.low %v438_v33, %v445_v34  ;;  %v463_v41 = vrot.slane %v447_v35, %v1589_v20  ;;  %v456_v43 = vrot.slane %v446_v36, %v1589_v20 }
  0x17   :  { %308 = vrot.lane.b32.xlu1 %v300_v29, %s1505_s1  ;;  %306 = vrot.lane.b32.xlu0 %v298_v30, %s1505_s1  ;;  %v477_v42 = vrot.slane %v449_v37, %v1589_v20  ;;  %v470_v44 = vrot.slane %v448_v38, %v1589_v20 }
  0x19   :  { %v480_v45 = vcombine.low %v463_v41, %v477_v42  ;;  %v478_v46 = vcombine.low %v456_v43, %v470_v44  ;;  %v481_v47 = vcombine.high %v463_v41, %v477_v42  ;;  %v479_v49 = vcombine.high %v456_v43, %v470_v44 }
  0x1b   :  { %312 = vrot.lane.b32.xlu1 %v301_v39, %s1505_s1  ;;  %310 = vrot.lane.b32.xlu0 %v299_v40, %s1505_s1 }
  0x1f   :  { %488 = vrot.lane.b32.xlu1 %v480_v45, %s1505_s1  ;;  %486 = vrot.lane.b32.xlu0 %v478_v46, %s1505_s1 }
  0x23   :  { %492 = vrot.lane.b32.xlu1 %v481_v47, %s1505_s1  ;;  %490 = vrot.lane.b32.xlu0 %v479_v49, %s1505_s1 }
  0x81   :  { %v128_v51 = vpop.permute.xlu1 %127  ;;  %v124_v52 = vpop.permute.xlu0 %123 }
  0x85   :  { %v130_v53 = vpop.permute.xlu1 %129  ;;  %v126_v54 = vpop.permute.xlu0 %125 }
  0x86   :  { %v134_v55 = vsel %vm133_vm0, %v128_v51, %v130_v53  ;;  %v137_v56 = vsel %vm133_vm0, %v130_v53, %v124_v52  ;;  %v135_v57 = vsel %vm133_vm0, %v126_v54, %v128_v51  ;;  %v136_v58 = vsel %vm133_vm0, %v124_v52, %v126_v54 }
  0x87   :  { %v144_v0 = vcombine.low %v134_v55, %v137_v56  ;;  %v145_v59 = vcombine.high %v134_v55, %v137_v56  ;;  %v142_v60 = vcombine.low %v136_v58, %v135_v57  ;;  %v143_v61 = vcombine.high %v136_v58, %v135_v57 }
  0x89   :  { %v166_v62 = vrot.slane %v144_v0, %v1589_v20  ;;  %v173_v9 = vrot.slane %v145_v59, %v1589_v20  ;;  %v152_v12 = vrot.slane %v142_v60, %v1589_v20  ;;  %v159_v13 = vrot.slane %v143_v61, %v1589_v20  ;;  %v309_v14 = vpop.permute.xlu1 %308  ;;  %v307_v16 = vpop.permute.xlu0 %306 }
  0x8a   :  { %v316_v40 = vsel %vm133_vm0, %v307_v16, %v309_v14 }
  0x8b   :  { %v174_v24 = vcombine.low %v152_v12, %v166_v62  ;;  %v175_v29 = vcombine.high %v152_v12, %v166_v62  ;;  %v176_v30 = vcombine.low %v159_v13, %v173_v9  ;;  %v177_v33 = vcombine.high %v159_v13, %v173_v9 }
  0x8d   :  { %v184_v34 = vrot.slane %v174_v24, %v1589_v20  ;;  %v191_v35 = vrot.slane %v176_v30, %v1589_v20  ;;  %v198_v36 = vrot.slane %v175_v29, %v1589_v20  ;;  %v205_v37 = vrot.slane %v177_v33, %v1589_v20  ;;  %v313_v38 = vpop.permute.xlu1 %312  ;;  %v311_v39 = vpop.permute.xlu0 %310 }
  0x8e   :  { %v317_v41 = vsel %vm133_vm0, %v313_v38, %v307_v16  ;;  %v314_v42 = vsel %vm133_vm0, %v311_v39, %v313_v38  ;;  %v315_v43 = vsel %vm133_vm0, %v309_v14, %v311_v39 }
  0x8f   :  { %v206_v44 = vcombine.high %v184_v34, %v184_v34  ;;  %v207_v45 = vcombine.high %v191_v35, %v191_v35  ;;  %v208_v46 = vcombine.high %v198_v36, %v198_v36  ;;  %v209_v47 = vcombine.high %v205_v37, %v205_v37 }
  0x90   :  { %v1729_v49 = vadd.f32 %v184_v34, %v1525_v1  ;;  %v1732_v51 = vadd.f32 %v198_v36, %v1530_v2  ;;  %v1735_v52 = vadd.f32 %v191_v35, %v1545_v7  ;;  %v1738_v53 = vadd.f32 %v205_v37, %v1550_v8 }
  0x91   :  { %v1741_v54 = vadd.f32 %v206_v44, %v1535_v3  ;;  %v1744_v55 = vadd.f32 %v208_v46, %v1540_v6  ;;  %v1747_v56 = vadd.f32 %v207_v45, %v1557_v10  ;;  %v1750_v1 = vadd.f32 %v209_v47, %v1562_v11  ;;  %v489_v2 = vpop.permute.xlu1 %488  ;;  %v487_v57 = vpop.permute.xlu0 %486 }
  0x92   :  { %v322_v58 = vcombine.low %v316_v40, %v315_v43  ;;  %v323_v7 = vcombine.high %v316_v40, %v315_v43  ;;  %v324_v0 = vcombine.low %v314_v42, %v317_v41  ;;  %v325_v59 = vcombine.high %v314_v42, %v317_v41 }
  0x93   :  { %v496_v8 = vsel %vm133_vm0, %v487_v57, %v489_v2  ;;  %v594_v3 = vcombine.low %v1729_v49, %v1732_v51  ;;  %v595_v6 = vcombine.low %v1741_v54, %v1744_v55  ;;  %v596_v10 = vcombine.low %v1735_v52, %v1738_v53 }
  0x94   :  { %v332_v11 = vrot.slane %v322_v58, %v1589_v20  ;;  %v339_v60 = vrot.slane %v323_v7, %v1589_v20  ;;  %v346_v61 = vrot.slane %v324_v0, %v1589_v20  ;;  %v353_v62 = vrot.slane %v325_v59, %v1589_v20 }
  0x95   :  { %v493_v9 = vpop.permute.xlu1 %492  ;;  %v491_v12 = vpop.permute.xlu0 %490  ;;  %v597_v13 = vcombine.low %v1747_v56, %v1750_v1  ;;  %v604_v14 = vrot.slane %v594_v3, %v1589_v20  ;;  %v611_v16 = vrot.slane %v595_v6, %v1589_v20  ;;  %v618_v24 = vrot.slane %v596_v10, %v1589_v20 }
  0x96   :  { %v354_v29 = vcombine.low %v332_v11, %v346_v61  ;;  %v355_v30 = vcombine.high %v332_v11, %v346_v61  ;;  %v356_v33 = vcombine.low %v339_v60, %v353_v62  ;;  %v357_v34 = vcombine.high %v339_v60, %v353_v62 }
  0x97   :  { %v497_v35 = vsel %vm133_vm0, %v493_v9, %v487_v57  ;;  %v494_v36 = vsel %vm133_vm0, %v491_v12, %v493_v9  ;;  %v495_v37 = vsel %vm133_vm0, %v489_v2, %v491_v12  ;;  %v625_v38 = vrot.slane %v597_v13, %v1589_v20 }
  0x98   :  { %v364_v39 = vrot.slane %v354_v29, %v1589_v20  ;;  %v371_v40 = vrot.slane %v356_v33, %v1589_v20  ;;  %v378_v41 = vrot.slane %v355_v30, %v1589_v20  ;;  %v385_v42 = vrot.slane %v357_v34, %v1589_v20 }
  0x99   :  { %v502_v43 = vcombine.low %v496_v8, %v495_v37  ;;  %v503_v44 = vcombine.high %v496_v8, %v495_v37  ;;  %v504_v45 = vcombine.low %v494_v36, %v497_v35  ;;  %v505_v46 = vcombine.high %v494_v36, %v497_v35 }
  0x9a   :  { %v386_v47 = vcombine.high %v364_v39, %v364_v39  ;;  %v387_v57 = vcombine.high %v371_v40, %v371_v40  ;;  %v388_v58 = vcombine.high %v378_v41, %v378_v41  ;;  %v389_v7 = vcombine.high %v385_v42, %v385_v42 }
  0x9b   :  { %v1781_v2 = vadd.f32 %v364_v39, %v1576_v17  ;;  %v1784_v0 = vadd.f32 %v378_v41, %v1581_v18  ;;  %v1787_v59 = vadd.f32 %v371_v40, %v1599_v22  ;;  %v1790_v3 = vadd.f32 %v385_v42, %v1604_v23 }
  0x9c   :  { %v1793_v8 = vadd.f32 %v386_v47, %v1586_v19  ;;  %v1796_v6 = vadd.f32 %v388_v58, %v1594_v21  ;;  %v1799_v10 = vadd.f32 %v387_v57, %v1619_v27  ;;  %v1802_v17 = vadd.f32 %v389_v7, %v1624_v28 }
  0x9d   :  { %v512_v18 = vrot.slane %v502_v43, %v1589_v20  ;;  %v519_v22 = vrot.slane %v503_v44, %v1589_v20  ;;  %v526_v11 = vrot.slane %v504_v45, %v1589_v20  ;;  %v533_v23 = vrot.slane %v505_v46, %v1589_v20 }
  0x9e   :  { %v627_v60 = vcombine.high %v604_v14, %v611_v16  ;;  %v629_v19 = vcombine.high %v618_v24, %v625_v38  ;;  %v626_v61 = vcombine.low %v604_v14, %v611_v16  ;;  %v628_v62 = vcombine.low %v618_v24, %v625_v38 }
  0x9f   :  { %v534_v21 = vcombine.low %v512_v18, %v526_v11  ;;  %v535_v9 = vcombine.high %v512_v18, %v526_v11  ;;  %v536_v12 = vcombine.low %v519_v22, %v533_v23  ;;  %v537_v27 = vcombine.high %v519_v22, %v533_v23 }
  0xa0   :  { %v643_v13 = vrot.slane %v627_v60, %v1589_v20  ;;  %v657_v28 = vrot.slane %v629_v19, %v1589_v20  ;;  %v636_v29 = vrot.slane %v626_v61, %v1589_v20  ;;  %v650_v30 = vrot.slane %v628_v62, %v1589_v20 }
  0xa1   :  { %v544_v33 = vrot.slane %v534_v21, %v1589_v20  ;;  %v551_v34 = vrot.slane %v536_v12, %v1589_v20  ;;  %v558_v35 = vrot.slane %v535_v9, %v1589_v20  ;;  %v565_v14 = vrot.slane %v537_v27, %v1589_v20 }
  0xa2   :  { %v660_v16 = vcombine.low %v643_v13, %v657_v28  ;;  %v658_v24 = vcombine.low %v636_v29, %v650_v30  ;;  %v661_v36 = vcombine.high %v643_v13, %v657_v28  ;;  %v659_v37 = vcombine.high %v636_v29, %v650_v30 }
  0xa3   :  { %v566_v38 = vcombine.high %v544_v33, %v544_v33  ;;  %v567_v39 = vcombine.high %v551_v34, %v551_v34  ;;  %v568_v40 = vcombine.high %v558_v35, %v558_v35  ;;  %v569_v41 = vcombine.high %v565_v14, %v565_v14 }
  0xa4   :  { %v1817_v42 = vadd.f32 %v544_v33, %v1610_v25  ;;  %v1820_v43 = vadd.f32 %v558_v35, %v1614_v26  ;;  %v1823_v44 = vadd.f32 %v551_v34, %v1650_v48  ;;  %v1826_v45 = vadd.f32 %v565_v14, %v1662_v63  ;;  %668 = vrot.lane.b32.xlu1 %v660_v16, %s1506_s12 }
  0xa5   :  { %v1830_v46 = vadd.f32 %v566_v38, %v1632_v31  ;;  %v1833_v47 = vadd.f32 %v568_v40, %v1636_v32  ;;  %v1836_v25 = vadd.f32 %v567_v39, %v1666_v4  ;;  %v1839_v26 = vadd.f32 %v569_v41, %v1672_v5  ;;  %666 = vrot.lane.b32.xlu0 %v658_v24, %s1506_s12 }
  0xa6   :  { %v775_v48 = vcombine.low %v1781_v2, %v1784_v0  ;;  %v776_v63 = vcombine.low %v1793_v8, %v1796_v6  ;;  %v777_v31 = vcombine.low %v1787_v59, %v1790_v3  ;;  %v778_v32 = vcombine.low %v1799_v10, %v1802_v17 }
  0xa7   :  { %v955_v4 = vcombine.low %v1817_v42, %v1820_v43  ;;  %v956_v5 = vcombine.low %v1830_v46, %v1833_v47  ;;  %v957_v57 = vcombine.low %v1823_v44, %v1826_v45  ;;  %v958_v58 = vcombine.low %v1836_v25, %v1839_v26 }
  0xa8   :  { %672 = vrot.lane.b32.xlu1 %v661_v36, %s1506_s12  ;;  %v785_v7 = vrot.slane %v775_v48, %v1589_v20  ;;  %v792_v18 = vrot.slane %v776_v63, %v1589_v20  ;;  %v799_v22 = vrot.slane %v777_v31, %v1589_v20  ;;  %v806_v11 = vrot.slane %v778_v32, %v1589_v20 }
  0xa9   :  { %670 = vrot.lane.b32.xlu0 %v659_v37, %s1506_s12  ;;  %v965_v23 = vrot.slane %v955_v4, %v1589_v20  ;;  %v972_v60 = vrot.slane %v956_v5, %v1589_v20  ;;  %v979_v19 = vrot.slane %v957_v57, %v1589_v20  ;;  %v986_v61 = vrot.slane %v958_v58, %v1589_v20 }
  0xaa   :  { %v808_v62 = vcombine.high %v785_v7, %v792_v18  ;;  %v810_v21 = vcombine.high %v799_v22, %v806_v11  ;;  %v807_v9 = vcombine.low %v785_v7, %v792_v18  ;;  %v809_v12 = vcombine.low %v799_v22, %v806_v11 }
  0xab   :  { %v988_v27 = vcombine.high %v965_v23, %v972_v60  ;;  %v990_v13 = vcombine.high %v979_v19, %v986_v61  ;;  %v987_v28 = vcombine.low %v965_v23, %v972_v60  ;;  %v989_v29 = vcombine.low %v979_v19, %v986_v61 }
  0xac   :  { %v824_v30 = vrot.slane %v808_v62, %v1589_v20  ;;  %v838_v33 = vrot.slane %v810_v21, %v1589_v20  ;;  %v817_v34 = vrot.slane %v807_v9, %v1589_v20  ;;  %v831_v35 = vrot.slane %v809_v12, %v1589_v20 }
  0xad   :  { %v1004_v24 = vrot.slane %v988_v27, %v1589_v20  ;;  %v1018_v36 = vrot.slane %v990_v13, %v1589_v20  ;;  %v997_v37 = vrot.slane %v987_v28, %v1589_v20  ;;  %v1011_v38 = vrot.slane %v989_v29, %v1589_v20 }
  0xae   :  { %v841_v14 = vcombine.low %v824_v30, %v838_v33  ;;  %v839_v16 = vcombine.low %v817_v34, %v831_v35  ;;  %v842_v39 = vcombine.high %v824_v30, %v838_v33  ;;  %v840_v40 = vcombine.high %v817_v34, %v831_v35 }
  0xaf   :  { %v1021_v41 = vcombine.low %v1004_v24, %v1018_v36  ;;  %v1019_v48 = vcombine.low %v997_v37, %v1011_v38  ;;  %v1022_v63 = vcombine.high %v1004_v24, %v1018_v36  ;;  %v1020_v31 = vcombine.high %v997_v37, %v1011_v38 }
  0xb0   :  { %849 = vrot.lane.b32.xlu1 %v841_v14, %s1506_s12  ;;  %847 = vrot.lane.b32.xlu0 %v839_v16, %s1506_s12 }
  0xb4   :  { %853 = vrot.lane.b32.xlu1 %v842_v39, %s1506_s12  ;;  %851 = vrot.lane.b32.xlu0 %v840_v40, %s1506_s12 }
  0xb8   :  { %1029 = vrot.lane.b32.xlu1 %v1021_v41, %s1506_s12  ;;  %1027 = vrot.lane.b32.xlu0 %v1019_v48, %s1506_s12 }
  0xbc   :  { %1033 = vrot.lane.b32.xlu1 %v1022_v63, %s1506_s12  ;;  %1031 = vrot.lane.b32.xlu0 %v1020_v31, %s1506_s12 }
 0x116   :  { %v669_v32 = vpop.permute.xlu1 %668 }
 0x117   :  { %v667_v4 = vpop.permute.xlu0 %666 }
 0x118   :  { %v677_v22 = vsel %vm674_vm1, %v667_v4, %v669_v32 }
 0x11a   :  { %v673_v5 = vpop.permute.xlu1 %672 }
 0x11b   :  { %v671_v57 = vpop.permute.xlu0 %670  ;;  %v678_v58 = vsel %vm674_vm1, %v673_v5, %v667_v4 }
 0x11c   :  { %v675_v7 = vsel %vm674_vm1, %v671_v57, %v673_v5  ;;  %v676_v18 = vsel %vm674_vm1, %v669_v32, %v671_v57 }
 0x11d   :  { %v683_v11 = vcombine.low %v677_v22, %v676_v18  ;;  %v685_v23 = vcombine.low %v675_v7, %v678_v58  ;;  %v684_v60 = vcombine.high %v677_v22, %v676_v18  ;;  %v686_v19 = vcombine.high %v675_v7, %v678_v58 }
 0x11f   :  { %v693_v21 = vrot.slane %v683_v11, %v1589_v20  ;;  %v707_v9 = vrot.slane %v685_v23, %v1589_v20  ;;  %v700_v12 = vrot.slane %v684_v60, %v1589_v20  ;;  %v714_v27 = vrot.slane %v686_v19, %v1589_v20 }
 0x121   :  { %v715_v29 = vcombine.low %v693_v21, %v707_v9  ;;  %v716_v30 = vcombine.high %v693_v21, %v707_v9  ;;  %v717_v38 = vcombine.low %v700_v12, %v714_v27  ;;  %v718_v39 = vcombine.high %v700_v12, %v714_v27 }
 0x122   :  { %v850_v61 = vpop.permute.xlu1 %849  ;;  %v848_v62 = vpop.permute.xlu0 %847 }
 0x123   :  { %v857_v33 = vsel %vm674_vm1, %v848_v62, %v850_v61  ;;  %v725_v31 = vrot.slane %v715_v29, %v1589_v20  ;;  %v739_v32 = vrot.slane %v716_v30, %v1589_v20  ;;  %v732_v57 = vrot.slane %v717_v38, %v1589_v20 }
 0x124   :  { %v746_v58 = vrot.slane %v718_v39, %v1589_v20 }
 0x125   :  { %v747_v22 = vcombine.high %v725_v31, %v725_v31  ;;  %v749_v60 = vcombine.high %v739_v32, %v739_v32  ;;  %v759_v9 = vmul.f32 %v725_v31, %v1729_v49  ;;  %v760_v30 = vmul.f32 %v739_v32, %v1732_v51 }
 0x126   :  { %v854_v13 = vpop.permute.xlu1 %853  ;;  %v852_v28 = vpop.permute.xlu0 %851  ;;  %v750_v21 = vcombine.high %v746_v58, %v746_v58  ;;  %v764_v49 = vmul.f32 %v746_v58, %v1738_v53 }
 0x127   :  { %v858_v34 = vsel %vm674_vm1, %v854_v13, %v848_v62  ;;  %v855_v35 = vsel %vm674_vm1, %v852_v28, %v854_v13  ;;  %v856_v14 = vsel %vm674_vm1, %v850_v61, %v852_v28  ;;  %v748_v62 = vcombine.high %v732_v57, %v732_v57 }
 0x128   :  { %v863_v16 = vcombine.low %v857_v33, %v856_v14  ;;  %v864_v24 = vcombine.high %v857_v33, %v856_v14  ;;  %v865_v36 = vcombine.low %v855_v35, %v858_v34  ;;  %v866_v37 = vcombine.high %v855_v35, %v858_v34 }
 0x129   :  { %v761_v33 = vmul.f32 %v747_v22, %v1741_v54  ;;  %v763_v34 = vmul.f32 %v732_v57, %v1735_v52  ;;  %v762_v35 = vmul.f32 %v749_v60, %v1744_v55  ;;  %v765_v51 = vmul.f32 %v748_v62, %v1747_v56 }
 0x12a   :  { %v1030_v40 = vpop.permute.xlu1 %1029  ;;  %v1028_v41 = vpop.permute.xlu0 %1027  ;;  %v873_v48 = vrot.slane %v863_v16, %v1589_v20  ;;  %v887_v63 = vrot.slane %v865_v36, %v1589_v20  ;;  %v880_v4 = vrot.slane %v864_v24, %v1589_v20  ;;  %v894_v5 = vrot.slane %v866_v37, %v1589_v20 }
 0x12b   :  { %v1037_v24 = vsel %vm674_vm1, %v1028_v41, %v1030_v40  ;;  %v766_v54 = vmul.f32 %v750_v21, %v1750_v1 }
 0x12c   :  { %v895_v7 = vcombine.low %v873_v48, %v887_v63  ;;  %v896_v18 = vcombine.high %v873_v48, %v887_v63  ;;  %v897_v19 = vcombine.low %v880_v4, %v894_v5  ;;  %v898_v61 = vcombine.high %v880_v4, %v894_v5 }
 0x12e   :  { %v1034_v11 = vpop.permute.xlu1 %1033  ;;  %v1032_v23 = vpop.permute.xlu0 %1031  ;;  %v905_v12 = vrot.slane %v895_v7, %v1589_v20  ;;  %v919_v27 = vrot.slane %v896_v18, %v1589_v20  ;;  %v912_v14 = vrot.slane %v897_v19, %v1589_v20  ;;  %v926_v16 = vrot.slane %v898_v61, %v1589_v20 }
 0x12f   :  { %v1038_v13 = vsel %vm674_vm1, %v1034_v11, %v1028_v41  ;;  %v1035_v28 = vsel %vm674_vm1, %v1032_v23, %v1034_v11  ;;  %v1036_v29 = vsel %vm674_vm1, %v1030_v40, %v1032_v23 }
 0x130   :  { %v1043_v36 = vcombine.low %v1037_v24, %v1036_v29  ;;  %v1044_v37 = vcombine.high %v1037_v24, %v1036_v29  ;;  %v1045_v38 = vcombine.low %v1035_v28, %v1038_v13  ;;  %v1046_v39 = vcombine.high %v1035_v28, %v1038_v13 }
 0x131   :  { %v927_v52 = vcombine.high %v905_v12, %v905_v12  ;;  %v929_v48 = vcombine.high %v919_v27, %v919_v27  ;;  %v928_v32 = vcombine.high %v912_v14, %v912_v14  ;;  %v930_v40 = vcombine.high %v926_v16, %v926_v16 }
 0x132   :  { %v1053_v53 = vrot.slane %v1043_v36, %v1589_v20  ;;  %v1060_v55 = vrot.slane %v1044_v37, %v1589_v20  ;;  %v1067_v63 = vrot.slane %v1045_v38, %v1589_v20  ;;  %v1074_v31 = vrot.slane %v1046_v39, %v1589_v20 }
 0x133   :  { %v939_v41 = vmul.f32 %v905_v12, %v1781_v2  ;;  %v940_v4 = vmul.f32 %v919_v27, %v1784_v0  ;;  %v941_v58 = vmul.f32 %v927_v52, %v1793_v8  ;;  %v942_v7 = vmul.f32 %v929_v48, %v1796_v6 }
 0x134   :  { %v1075_v5 = vcombine.low %v1053_v53, %v1067_v63  ;;  %v1076_v56 = vcombine.high %v1053_v53, %v1067_v63  ;;  %v1077_v57 = vcombine.low %v1060_v55, %v1074_v31  ;;  %v1078_v1 = vcombine.high %v1060_v55, %v1074_v31 }
 0x135   :  { %v943_v18 = vmul.f32 %v912_v14, %v1787_v59  ;;  %v944_v22 = vmul.f32 %v926_v16, %v1790_v3  ;;  %v945_v60 = vmul.f32 %v928_v32, %v1799_v10  ;;  %v946_v19 = vmul.f32 %v930_v40, %v1802_v17 }
 0x136   :  { %v1085_v11 = vrot.slane %v1075_v5, %v1589_v20  ;;  %v1092_v23 = vrot.slane %v1077_v57, %v1589_v20  ;;  %v1099_v2 = vrot.slane %v1076_v56, %v1589_v20  ;;  %v1106_v0 = vrot.slane %v1078_v1, %v1589_v20 }
 0x137   :  { %v1127_v61 = vadd.f32 %v939_v41, %v759_v9  ;;  %v1128_v8 = vadd.f32 %v940_v4, %v760_v30  ;;  %v1129_v12 = vadd.f32 %v941_v58, %v761_v33  ;;  %v1130_v28 = vadd.f32 %v942_v7, %v762_v35 }
 0x138   :  { %v1107_v62 = vcombine.high %v1085_v11, %v1085_v11  ;;  %v1108_v6 = vcombine.high %v1092_v23, %v1092_v23  ;;  %v1109_v21 = vcombine.high %v1099_v2, %v1099_v2  ;;  %v1110_v59 = vcombine.high %v1106_v0, %v1106_v0 }
 0x139   :  { %v1119_v3 = vmul.f32 %v1085_v11, %v1817_v42  ;;  %v1120_v27 = vmul.f32 %v1099_v2, %v1820_v43  ;;  %v1123_v13 = vmul.f32 %v1092_v23, %v1823_v44  ;;  %v1124_v17 = vmul.f32 %v1106_v0, %v1826_v45 }
 0x13a   :  { %v1121_v29 = vmul.f32 %v1107_v62, %v1830_v46  ;;  %v1122_v10 = vmul.f32 %v1109_v21, %v1833_v47  ;;  %v1131_v9 = vadd.f32 %v943_v18, %v763_v34  ;;  %v1125_v30 = vmul.f32 %v1108_v6, %v1836_v25 }
 0x13b   :  { %v1135_v14 = vsub.f32 %v1127_v61, %v1119_v3  ;;  %v1136_v16 = vsub.f32 %v1128_v8, %v1120_v27  ;;  %v1132_v24 = vadd.f32 %v944_v22, %v764_v49  ;;  %v1126_v33 = vmul.f32 %v1110_v59, %v1839_v26 }
 0x13c   :  { %v1137_v42 = vsub.f32 %v1129_v12, %v1121_v29  ;;  %v1138_v36 = vsub.f32 %v1130_v28, %v1122_v10  ;;  %v1133_v43 = vadd.f32 %v945_v60, %v765_v51  ;;  %v1139_v37 = vsub.f32 %v1131_v9, %v1123_v13 }
 0x13d   :  { %v1134_v44 = vadd.f32 %v946_v19, %v766_v54  ;;  %v1140_v35 = vsub.f32 %v1132_v24, %v1124_v17  ;;  %v1151_v46 = vadd.f32 1.0, %v1135_v14  ;;  %v1152_v39 = vadd.f32 1.0, %v1136_v16 }
 0x13e   :  { %v1141_v38 = vsub.f32 %v1133_v43, %v1125_v30  ;;  %v1153_v47 = vadd.f32 1.0, %v1137_v42  ;;  %v1154_v45 = vadd.f32 1.0, %v1138_v36  ;;  %v1155_v34 = vadd.f32 1.0, %v1139_v37 }
 0x13f   :  { %v1142_v52 = vsub.f32 %v1134_v44, %v1126_v33  ;;  %1472 = vrcp.f32 %v1151_v46  ;;  %v1156_v25 = vadd.f32 1.0, %v1140_v35  ;;  %v1143_v26 = vadd.f32 1.0, %v1119_v3 }
 0x140   :  { %1474 = vrcp.f32 %v1152_v39  ;;  %v1157_v48 = vadd.f32 1.0, %v1141_v38  ;;  %v1144_v54 = vadd.f32 1.0, %v1120_v27  ;;  %v1145_v55 = vadd.f32 1.0, %v1121_v29 }
 0x141   :  { %1476 = vrcp.f32 %v1153_v47  ;;  %v1158_v49 = vadd.f32 1.0, %v1142_v52  ;;  %v1146_v32 = vadd.f32 1.0, %v1122_v10  ;;  %v1147_v4 = vadd.f32 1.0, %v1123_v13 }
 0x142   :  { %1478 = vrcp.f32 %v1154_v45  ;;  %v1148_v57 = vadd.f32 1.0, %v1124_v17  ;;  %v1149_v7 = vadd.f32 1.0, %v1125_v30  ;;  %v1150_v11 = vadd.f32 1.0, %v1126_v33 }
 0x143   :  { %1480 = vrcp.f32 %v1155_v34  ;;  %v1303_v17 = vadd.s32 128, %v1701_v50  ;;  %v1304_v36 = vadd.s32 256, %v1701_v50  ;;  %v1305_v44 = vadd.s32 384, %v1701_v50 }
 0x144   :  { %1482 = vrcp.f32 %v1156_v25  ;;  %v1306_v46 = vmul.u32 128, %v1569_v15  ;;  %v1309_v39 = vshra.s32 %v1701_v50, 2 }
 0x145   :  { %1484 = vrcp.f32 %v1157_v48  ;;  %v1310_v47 = vshra.s32 %v1303_v17, 2  ;;  %v1311_v48 = vshra.s32 %v1304_v36, 2 }
 0x146   :  { %1486 = vrcp.f32 %v1158_v49 }
 0x149   :  { %v1473_v51 = vpop.eup %1472 }
 0x14a   :  { %v1475_v53 = vpop.eup %1474  ;;  %v1160_v63 = vmul.f32 %v1473_v51, %v1143_v26 }
 0x14b   :  { %v1477_v31 = vpop.eup %1476  ;;  %v1162_v40 = vmul.f32 %v1475_v53, %v1144_v54  ;;  %v1312_v54 = vshra.s32 %v1305_v44, 2  ;;  %v1313_v53 = vadd.s32 %v1309_v39, %v1306_v46 }
 0x14c   :  { %v1479_v41 = vpop.eup %1478  ;;  %v1164_v5 = vmul.f32 %v1477_v31, %v1145_v55  ;;  %1488 = vlog2.f32 %v1160_v63  ;;  %v1314_v55 = vadd.s32 %v1310_v47, %v1306_v46  ;;  %v1315_v31 = vadd.s32 %v1311_v48, %v1306_v46 }
 0x14d   :  { %v1481_v56 = vpop.eup %1480  ;;  %v1166_v1 = vmul.f32 %v1479_v41, %v1146_v32  ;;  %1490 = vlog2.f32 %v1162_v40  ;;  %v1423_v32 = vand.u32 3, %v1701_v50  ;;  %v1424_v40 = vand.u32 3, %v1303_v17 }
 0x14e   :  { %v1483_v58 = vpop.eup %1482  ;;  %v1168_v18 = vmul.f32 %v1481_v56, %v1147_v4  ;;  %1492 = vlog2.f32 %v1164_v5  ;;  %vm1317_vm2 = vcmp.lt.s32.totalorder %v1313_v53, 8  ;;  %vm1318_vm3 = vcmp.lt.s32.totalorder %v1314_v55, 8 }
 0x14f   :  { %v1485_v22 = vpop.eup %1484  ;;  %v1170_v23 = vmul.f32 %v1483_v58, %v1148_v57  ;;  %1494 = vlog2.f32 %v1166_v1  ;;  %v1316_v57 = vadd.s32 %v1312_v54, %v1306_v46  ;;  %vm1319_vm4 = vcmp.lt.s32.totalorder %v1315_v31, 8 }
 0x150   :  { %v1487_v2 = vpop.eup %1486  ;;  %v1172_v0 = vmul.f32 %v1485_v22, %v1149_v7  ;;  %1496 = vlog2.f32 %v1168_v18  ;;  %v1425_v7 = vand.u32 3, %v1304_v36  ;;  %v1426_v18 = vand.u32 3, %v1305_v44 }
 0x151   :  { %v1174_v60 = vmul.f32 %v1487_v2, %v1150_v11  ;;  %1498 = vlog2.f32 %v1170_v23  ;;  %vm1427_vm5 = vcmp.eq.s32.totalorder %v1423_v32, 0  ;;  %vm1428_vm6 = vcmp.eq.s32.totalorder %v1424_v40, 0 }
 0x152   :  { %1500 = vlog2.f32 %v1172_v0  ;;  %vm1320_vm7 = vcmp.lt.s32.totalorder %v1316_v57, 8  ;;  %vm1429_vm8 = vcmp.eq.s32.totalorder %v1425_v7, 0  ;;  %vm1430_vm9 = vcmp.eq.s32.totalorder %v1426_v18, 0 }
 0x153   :  { %1502 = vlog2.f32 %v1174_v60 }
 0x156   :  { %v1489_v19 = vpop.eup %1488 }
 0x157   :  { %v1491_v61 = vpop.eup %1490  ;;  %v1176_v8 = vmul.f32 0.6931472, %v1489_v19 }
 0x158   :  { %v1493_v62 = vpop.eup %1492  ;;  %v1178_v6 = vmul.f32 0.6931472, %v1491_v61 }
 0x159   :  { %v1495_v21 = vpop.eup %1494  ;;  %v1180_v59 = vmul.f32 0.6931472, %v1493_v62  ;;  %v1191_v12 = vsub.f32 0.0, %v1176_v8 }
 0x15a   :  { %v1497_v3 = vpop.eup %1496  ;;  %v1182_v27 = vmul.f32 0.6931472, %v1495_v21  ;;  %v1192_v13 = vsub.f32 0.0, %v1178_v6 }
 0x15b   :  { %v1499_v28 = vpop.eup %1498  ;;  %v1184_v29 = vmul.f32 0.6931472, %v1497_v3  ;;  %v1193_v10 = vsub.f32 0.0, %v1180_v59 }
 0x15c   :  { %v1501_v9 = vpop.eup %1500  ;;  %v1186_v30 = vmul.f32 0.6931472, %v1499_v28  ;;  %v1194_v14 = vsub.f32 0.0, %v1182_v27  ;;  %v1333_v16 = vcombine.low %v1191_v12, %v1192_v13 }
 0x15d   :  { %v1503_v24 = vpop.eup %1502  ;;  %v1188_v33 = vmul.f32 0.6931472, %v1501_v9  ;;  %v1195_v42 = vsub.f32 0.0, %v1184_v29 }
 0x15e   :  { %v1190_v43 = vmul.f32 0.6931472, %v1503_v24  ;;  %v1196_v37 = vsub.f32 0.0, %v1186_v30  ;;  %v1334_v35 = vcombine.low %v1193_v10, %v1194_v14  ;;  %v1343_v34 = vrot.slane %v1333_v16, %v1589_v20 }
 0x15f   :  { %v1197_v38 = vsub.f32 0.0, %v1188_v33 }
 0x160   :  { %v1198_v52 = vsub.f32 0.0, %v1190_v43  ;;  %v1335_v45 = vcombine.low %v1195_v42, %v1196_v37  ;;  %v1350_v25 = vrot.slane %v1334_v35, %v1589_v20 }
 0x162   :  { %v1336_v49 = vcombine.low %v1197_v38, %v1198_v52  ;;  %v1365_v26 = vcombine.low %v1343_v34, %v1350_v25  ;;  %v1366_v51 = vcombine.high %v1343_v34, %v1350_v25  ;;  %v1357_v63 = vrot.slane %v1335_v45, %v1589_v20 }
 0x164   :  { %v1364_v15 = vrot.slane %v1336_v49, %v1589_v20  ;;  %v1375_v5 = vrot.slane %v1365_v26, %v1589_v20  ;;  %v1382_v56 = vrot.slane %v1366_v51, %v1589_v20 }
 0x166   :  { %v1367_v41 = vcombine.low %v1357_v63, %v1364_v15  ;;  %v1368_v4 = vcombine.high %v1357_v63, %v1364_v15 }
 0x168   :  { %v1389_v1 = vrot.slane %v1367_v41, %v1589_v20  ;;  %v1396_v58 = vrot.slane %v1368_v4, %v1589_v20 }
 0x16a   :  { %v1397_v22 = vcombine.low %v1375_v5, %v1389_v1  ;;  %v1398_v11 = vcombine.high %v1375_v5, %v1389_v1  ;;  %v1399_v23 = vcombine.low %v1382_v56, %v1396_v58  ;;  %v1400_v2 = vcombine.high %v1382_v56, %v1396_v58 }
 0x16c   :  { %v1405_v0 = vsel %vm1317_vm2, %v1397_v22, 0.0  ;;  %v1406_v60 = vsel %vm1318_vm3, %v1399_v23, 0.0  ;;  %v1407_v19 = vsel %vm1319_vm4, %v1398_v11, 0.0  ;;  %v1408_v62 = vsel %vm1320_vm7, %v1400_v2, 0.0 }
 0x16d   :  { %v1436_v61 = vsel %vm1427_vm5, %v1405_v0, 0.0  ;;  %v1437_v8 = vsel %vm1428_vm6, %v1406_v60, 0.0  ;;  %v1438_v20 = vsel %vm1429_vm8, %v1407_v19, 0.0  ;;  %v1439_v59 = vsel %vm1430_vm9, %v1408_v62, 0.0 }
 0x16e   :  { %v1440_v6 = vadd.f32 %v1437_v8, %v1436_v61 }
 0x170   :  { %v1441_v21 = vadd.f32 %v1440_v6, %v1438_v20 }
 0x172   :  { %v1442_v12 = vadd.f32 %v1441_v21, %v1439_v59 }
 0x174   :  { %1443 = vadd.xlane.f32.xlu0 %v1442_v12 }
 0x201   :  { %v1444_v3 = vpop.xlane.xlu0 %1443 }
 0x202   :  { %v1445_v27 = vrot.slane %v1444_v3, 4 }
 0x204   :  { %v1446_v13 = vadd.f32 %v1445_v27, %v1444_v3 }
 0x206   :  { %v1447_v28 = vrot.slane %v1446_v13, 2 }
 0x208   :  { %v1448_v29 = vadd.f32 %v1447_v28, %v1446_v13 }
 0x20a   :  { %v1449_v10 = vrot.slane %v1448_v29, 1 }
 0x20c   :  { %v1450_v17 = vadd.f32 %v1449_v10, %v1448_v29 }
 0x20e   :  { %1459 = vpush %v1450_v17 }
 0x23f   :  { %s1460_s13 = spop %1459 }
 0x240   :  { %v1452_v9 = vstv %s1460_s13 }
 0x241   :  { %v1453_v30 = vsel %vm1431_vm10, %v1452_v9, 0.0 }
 0x242   :  { %1454 = vst [vmem:[%s1977_s2] sm:$0x1] %v1453_v30 }

</bundles_post_ra>
